<compile_context>
chip_gen: v5e
topology: v5e:2x2
jax: 0.10.0
libtpu: 0.0.40
codegen_flags: <defaults>
</compile_context>

<pallas_src>
import math
from functools import partial

import jax
import jax.numpy as jnp
from jax.experimental import pallas as pl
from jax.experimental.pallas import tpu as pltpu


# ----------------------------------------------------------------------------
# 1-D bicubic interpolation matrices (tiny, built on the XLA side)
# ----------------------------------------------------------------------------
_A = -0.75  # PyTorch's cubic-convolution constant


def _cubic1(x):
    return ((_A + 2.0) * x - (_A + 3.0)) * x * x + 1.0


def _cubic2(x):
    return ((_A * x - 5.0 * _A) * x + 8.0 * _A) * x - 4.0 * _A


def _bicubic_matrix(in_size: int, out_size: int, align_corners: bool) -> jnp.ndarray:
    """(out_size, in_size) matrix M so that y = M @ x is a 1-D bicubic resize.

    Matches torch.nn.functional.interpolate(mode='bicubic', antialias=False):
    clamped borders, duplicate taps accumulate.
    """
    dst = jnp.arange(out_size, dtype=jnp.float32)
    if align_corners:
        scale = 0.0 if out_size <= 1 else (in_size - 1) / (out_size - 1)
        src = dst * scale
    else:
        scale = in_size / out_size
        src = (dst + 0.5) * scale - 0.5
    i0 = jnp.floor(src)
    t = src - i0
    w = jnp.stack(
        [_cubic2(t + 1.0), _cubic1(t), _cubic1(1.0 - t), _cubic2(2.0 - t)], axis=-1
    )                                                           # (out, 4)
    idx = i0[:, None].astype(jnp.int32) + jnp.arange(-1, 3)[None, :]
    idx = jnp.clip(idx, 0, in_size - 1)                         # clamped borders
    mat = jnp.zeros((out_size, in_size), dtype=jnp.float32)
    rows = jnp.broadcast_to(jnp.arange(out_size)[:, None], idx.shape)
    return mat.at[rows, idx].add(w)


# ----------------------------------------------------------------------------
# small sizing helpers
# ----------------------------------------------------------------------------
def _rup(x: int, m: int) -> int:
    return (x + m - 1) // m * m


def _vmem_limit_bytes() -> int:
    """Scoped-VMEM limit, derived from the chip's physical VMEM when possible."""
    try:
        cap = int(pltpu.get_tpu_info().vmem_capacity_bytes)
    except Exception:
        cap = 64 * 1024 * 1024          # conservative (v7x per-core VMEM)
    return min(96 * 1024 * 1024, (cap * 3) // 4)


def _pick_rows(nc, per_row_bytes, budget_bytes, result_row_bytes, cap, sublane_align):
    """Number of (batch*channel) rows processed per grid step."""
    rows = budget_bytes // max(per_row_bytes, 1)
    # keep the per-step f32 matmul result modest (bounded vreg/VMEM pressure)
    rows = min(rows, (2 * 1024 * 1024) // max(result_row_bytes, 1))
    rows = min(rows, cap, nc)
    rows = max(1, rows)
    # leave >= 2 grid steps when there is enough work (v7x megacore sharding)
    if nc >= 16 and rows >= nc:
        rows = (nc + 1) // 2
    if sublane_align:   # rows is the 2nd-minor dim of the fused-path blocks
        rows = max(8, (rows // 8) * 8)
    return rows


# ----------------------------------------------------------------------------
# Pallas kernels
# ----------------------------------------------------------------------------
def _fused_kernel(x_ref, m_ref, o_ref):
    # x_ref: (Bc, H*W)   m_ref: (H*W, Hout*Wout)   o_ref: (Bc, Hout*Wout)
    # Single lane-dense MXU matmul; f32 accumulation, output cast to x dtype.
    o_ref[...] = jnp.dot(
        x_ref[...], m_ref[...], preferred_element_type=jnp.float32
    ).astype(o_ref.dtype)


def _separable_kernel(x_ref, ah_ref, awt_ref, o_ref):
    # x_ref: (Bc, H, W)  ah_ref: (Hout, H)  awt_ref: (W, Wout)
    # o_ref: (Bc, Hout, Wout)
    bc, h, w = x_ref.shape
    hout = ah_ref.shape[0]
    wout = awt_ref.shape[1]
    x = x_ref[...]
    # W pass: one flat 2-D matmul on the MXU (f32 accumulation).
    t = jnp.dot(x.reshape(bc * h, w), awt_ref[...], preferred_element_type=jnp.float32)
    t = t.reshape(bc, h, wout)
    # H pass: batched matmul over the plane dim (flash-attention-style einsum).
    ah = jnp.broadcast_to(ah_ref[...].astype(jnp.float32)[None], (bc, hout, h))
    out = jnp.einsum("boh,bhw->bow", ah, t, preferred_element_type=jnp.float32)
    o_ref[...] = out.astype(o_ref.dtype)


# ----------------------------------------------------------------------------
# wrapper: bicubic resize via Pallas
# ----------------------------------------------------------------------------
def _resize_bicubic_impl(x, out_hw, align_corners):
    *lead, h, w = x.shape
    hout, wout = int(out_hw[0]), int(out_hw[1])
    nc = 1
    for d in lead:
        nc *= int(d)
    nc = max(int(nc), 1)

    dtype = x.dtype
    itemsize = x.dtype.itemsize
    # keep matmul operands in the input dtype when it is a low-precision float
    mat_dtype = jnp.float32 if dtype == jnp.float32 else dtype
    mat_isz = 4 if mat_dtype == jnp.float32 else 2

    ah = _bicubic_matrix(h, hout, align_corners)        # (Hout, H), f32
    aw = _bicubic_matrix(w, wout, align_corners)        # (Wout, W), f32

    hw, howo = h * w, hout * wout
    vmem_limit = _vmem_limit_bytes()

    # Fused path: single interpolation matrix, only when it stays small enough
    # to sit resident in VMEM (typical efficientvit decoder shapes qualify).
    use_fused = (hw * howo * 4 <= 4 * 1024 * 1024) and (hw <= 512)

    if use_fused:
        # M[(h w), (ho wo)] = Ah[ho, h] * Aw[wo, w]
        m = jnp.einsum("oh,pw->hwop", ah, aw).reshape(hw, howo).astype(mat_dtype)
        m_vmem = _rup(hw, 8) * _rup(howo, 128) * mat_isz
        per_row = 2 * (_rup(hw, 128) + _rup(howo, 128)) * itemsize  # double-buffered
        budget = max(2 * 1024 * 1024, vmem_limit // 2 - 2 * m_vmem)
        bc = _pick_rows(nc, per_row, budget, _rup(howo, 128) * 4,
                        cap=256, sublane_align=True)

        nc_pad = _rup(nc, bc)
        x2 = x.reshape(nc, hw)
        if nc_pad != nc:
            x2 = jnp.pad(x2, ((0, nc_pad - nc), (0, 0)))

        out2 = pl.pallas_call(
            _fused_kernel,
            out_shape=jax.ShapeDtypeStruct((nc_pad, howo), dtype),
            grid_spec=pltpu.PrefetchScalarGridSpec(
                num_scalar_prefetch=0,
                grid=(nc_pad // bc,),
                in_specs=[
                    pl.BlockSpec((bc, hw), lambda i: (i, 0)),
                    # constant block index -> DMA'd once, stays resident in VMEM
                    pl.BlockSpec((hw, howo), lambda i: (0, 0)),
                ],
                out_specs=pl.BlockSpec((bc, howo), lambda i: (i, 0)),
            ),
            compiler_params=pltpu.CompilerParams(
                dimension_semantics=("parallel",),
                vmem_limit_bytes=vmem_limit,
            ),
        )(x2, m)
        return out2[:nc].reshape(*lead, hout, wout)

    # --- separable fallback (larger spatial sizes; Wout is >=128 there) ------
    ahc = ah.astype(mat_dtype)                  # (Hout, H)
    awt = aw.T.astype(mat_dtype)                # (W, Wout)
    in_bytes = _rup(h, 8) * _rup(w, 128) * itemsize
    out_bytes = _rup(hout, 8) * _rup(wout, 128) * itemsize
    t_bytes = _rup(h, 8) * _rup(wout, 128) * 4          # f32 intermediate
    per_row = 2 * (in_bytes + out_bytes) + t_bytes
    budget = max(2 * 1024 * 1024, vmem_limit // 2)
    bc = _pick_rows(nc, per_row, budget, _rup(hout, 8) * _rup(wout, 128) * 4,
                    cap=128, sublane_align=False)

    nc_pad = _rup(nc, bc)
    x3 = x.reshape(nc, h, w)
    if nc_pad != nc:
        x3 = jnp.pad(x3, ((0, nc_pad - nc), (0, 0), (0, 0)))

    out3 = pl.pallas_call(
        _separable_kernel,
        out_shape=jax.ShapeDtypeStruct((nc_pad, hout, wout), dtype),
        grid_spec=pltpu.PrefetchScalarGridSpec(
            num_scalar_prefetch=0,
            grid=(nc_pad // bc,),
            in_specs=[
                pl.BlockSpec((bc, h, w), lambda i: (i, 0, 0)),
                pl.BlockSpec((hout, h), lambda i: (0, 0)),
                pl.BlockSpec((w, wout), lambda i: (0, 0)),
            ],
            out_specs=pl.BlockSpec((bc, hout, wout), lambda i: (i, 0, 0)),
        ),
        compiler_params=pltpu.CompilerParams(
            dimension_semantics=("parallel",),
            vmem_limit_bytes=vmem_limit,
        ),
    )(x3, ahc, awt)
    return out3[:nc].reshape(*lead, hout, wout)


_resize_bicubic = partial(jax.jit, static_argnames=("out_hw", "align_corners"))(
    _resize_bicubic_impl
)


# ----------------------------------------------------------------------------
# UpSampleLayer (JAX mirror of the PyTorch module, forward only)
# ----------------------------------------------------------------------------
def val2list(x, repeat_time=1):
    if isinstance(x, (list, tuple)):
        return list(x)
    return [x for _ in range(repeat_time)]


class UpSampleLayer:
    def __init__(self, mode="bicubic", size=None, factor=2, align_corners=False):
        self.mode = mode
        self.size = val2list(size, 2) if size is not None else None
        self.factor = None if self.size is not None else factor
        self.align_corners = align_corners

    def __call__(self, x: jnp.ndarray) -> jnp.ndarray:
        if (self.size is not None and tuple(x.shape[-2:]) == tuple(self.size)) \
                or self.factor == 1:
            return x
        h, w = x.shape[-2:]
        if self.size is not None:
            out_hw = (int(self.size[0]), int(self.size[1]))
        else:
            out_hw = (int(math.floor(h * self.factor)),
                      int(math.floor(w * self.factor)))
        if self.mode == "bicubic":
            return _resize_bicubic(x, out_hw=out_hw,
                                   align_corners=bool(self.align_corners))
        # TODO(synk): 'bilinear'/'nearest'/'area' modes not implemented
        # (module default is 'bicubic').
        raise NotImplementedError(f"resize(mode={self.mode}) is not implemented.")


# ----------------------------------------------------------------------------
# demo / sanity check
# ----------------------------------------------------------------------------
if __name__ == "__main__":
    key = jax.random.PRNGKey(0)
    x = jax.random.normal(key, (2, 4, 16, 16), dtype=jnp.float32)

    layer = UpSampleLayer(mode="bicubic", factor=2, align_corners=False)
    y = layer(x)
    jax.block_until_ready(y)

    assert y.shape == (2, 4, 32, 32), y.shape
    assert y.dtype == x.dtype, y.dtype

    ah = _bicubic_matrix(16, 32, False)
    aw = _bicubic_matrix(16, 32, False)

    # Reference 1: plain-XLA matmul with the SAME fused interpolation matrix.
    # Tight tolerance (only accumulation-order differences vs. the kernel).
    m = jnp.einsum("oh,pw->hwop", ah, aw).reshape(16 * 16, 32 * 32)
    y_ref = (x.reshape(8, 16 * 16) @ m).reshape(2, 4, 32, 32)
    err1 = float(jnp.max(jnp.abs(y - y_ref)))
    assert jnp.allclose(y, y_ref, rtol=1e-3, atol=1e-3), err1

    # Reference 2: separable definition (guards the fused-matrix construction).
    # Looser tolerance covers TPU default matmul operand rounding.
    y_sep = jnp.einsum("oh,nchw,pw->ncop", ah, x, aw)
    err2 = float(jnp.max(jnp.abs(y - y_sep)))
    assert jnp.allclose(y, y_sep, rtol=5e-2, atol=5e-2), err2

    # bf16 path: matmul operands stay bf16 (native MXU), f32 accumulation.
    y_bf16 = layer(x.astype(jnp.bfloat16))
    jax.block_until_ready(y_bf16)
    assert y_bf16.shape == (2, 4, 32, 32)
    assert y_bf16.dtype == jnp.bfloat16
    err3 = float(jnp.max(jnp.abs(y_bf16.astype(jnp.float32) - y_ref)))
    assert err3 < 0.1, err3

    print("KERNEL_OK")
</pallas_src>

<mosaic_0001>
module attributes {stable_mosaic.version = 11 : i64} {
  func.func @_fused_kernel(%arg0: i32, %arg1: memref<8x256xf32, #tpu.memory_space<vmem>>, %arg2: memref<256x1024xf32, #tpu.memory_space<vmem>>, %arg3: memref<8x1024xf32, #tpu.memory_space<vmem>>) attributes {dimension_semantics = [#tpu.dimension_semantics<parallel>], iteration_bounds = array<i64: 1>, scalar_prefetch = 0 : i64, scratch_operands = 0 : i64, tpu.core_type = #tpu.core_type<tc>, window_params = [{transform_indices = @transform_0, window_bounds = array<i64: 8, 256>}, {pipeline_mode = #tpu.pipeline_mode<synchronous>, transform_indices = @transform_1, window_bounds = array<i64: 256, 1024>}, {transform_indices = @transform_2, window_bounds = array<i64: 8, 1024>}]} {
    %c0 = arith.constant 0 : index
    %c0_0 = arith.constant 0 : index
    %0 = vector.load %arg1[%c0, %c0_0] : memref<8x256xf32, #tpu.memory_space<vmem>>, vector<8x256xf32>
    %c0_1 = arith.constant 0 : index
    %c0_2 = arith.constant 0 : index
    %1 = vector.load %arg2[%c0_1, %c0_2] : memref<256x1024xf32, #tpu.memory_space<vmem>>, vector<256x1024xf32>
    %cst = arith.constant dense<0.000000e+00> : vector<8x1024xf32>
    %2 = tpu.matmul %0, %1, %cst {dimension_numbers = #tpu.dot_dimension_numbers<[1], [0], [0], [1], [0, 0, 1, 1], [], []>} : vector<8x256xf32>, vector<256x1024xf32>, vector<8x1024xf32> -> vector<8x1024xf32>
    %c0_3 = arith.constant 0 : index
    %c0_4 = arith.constant 0 : index
    %3 = vector.load %arg3[%c0_3, %c0_4] : memref<8x1024xf32, #tpu.memory_space<vmem>>, vector<8x1024xf32>
    tpu.vector_store %arg3[%c0_3, %c0_4], %2 {strides = array<i32>} : memref<8x1024xf32, #tpu.memory_space<vmem>>, vector<8x1024xf32>,
    return
  }
  func.func @transform_0(%arg0: i32) -> (i32, i32) {
    %c0_i32 = arith.constant 0 : i32
    %c0_i32_0 = arith.constant 0 : i32
    return %arg0, %c0_i32 : i32, i32
  }
  func.func @transform_1(%arg0: i32) -> (i32, i32) {
    %c0_i32 = arith.constant 0 : i32
    %c0_i32_0 = arith.constant 0 : i32
    %c0_i32_1 = arith.constant 0 : i32
    return %c0_i32, %c0_i32_0 : i32, i32
  }
  func.func @transform_2(%arg0: i32) -> (i32, i32) {
    %c0_i32 = arith.constant 0 : i32
    %c0_i32_0 = arith.constant 0 : i32
    return %arg0, %c0_i32 : i32, i32
  }
}

</mosaic_0001>

<bundles_post_ra>
// kernel: _resize_bicubic_impl.1
= control target key start
LH: loop header
LB: loop body
LE: loop exit
PB: predicated region body
PF: predicated region fallthrough
CT: control target
= control target key end

     0   :  { %s1434_s1 = inlined_call_operand.vmem [shape: f32[256,1024], index: 1, kind: input, shape index: {}]   ;;  %s1435_s0 = inlined_call_operand.vmem [shape: f32[8,256], index: 0, kind: input, shape index: {}]   ;;  %s1436_s2 = inlined_call_operand.vmem [shape: f32[8,1024], index: 2, kind: output, shape index: {}]  }
   0x1   :  { %v134_v0 = vld [vmem:[%s1434_s1 + $0x3c8] sm:$0xff]  ;;  %v133_v6 = vld [vmem:[%s1434_s1 + $0x3c0] sm:$0xff]  ;;  %v136_v60 = vld [vmem:[%s1434_s1 + $0x3d8] sm:$0xff] }
   0x2   :  { %v262_v1 = vld [vmem:[%s1434_s1 + $0x7c8] sm:$0xff]  ;;  %309 = vmatpush.msra.mxu2 %v134_v0  ;;  %v261_v7 = vld [vmem:[%s1434_s1 + $0x7c0] sm:$0xff]  ;;  %269 = vmatpush.msra.mxu0 %v133_v6  ;;  %v264_v61 = vld [vmem:[%s1434_s1 + $0x7d8] sm:$0xff] }
   0x3   :  { %v126_v2 = vld [vmem:[%s1434_s1 + $0x388] sm:$0xff]  ;;  %329 = vmatpush.msra.mxu3 %v262_v1  ;;  %v125_v8 = vld [vmem:[%s1434_s1 + $0x380] sm:$0xff]  ;;  %289 = vmatpush.msra.mxu1 %v261_v7  ;;  %v128_v0 = vld [vmem:[%s1434_s1 + $0x398] sm:$0xff] }
   0x4   :  { %v254_v3 = vld [vmem:[%s1434_s1 + $0x788] sm:$0xff]  ;;  %310 = vmatpush.msra.mxu2 %v126_v2  ;;  %v253_v9 = vld [vmem:[%s1434_s1 + $0x780] sm:$0xff]  ;;  %270 = vmatpush.msra.mxu0 %v125_v8  ;;  %v256_v1 = vld [vmem:[%s1434_s1 + $0x798] sm:$0xff] }
   0x5   :  { %v118_v4 = vld [vmem:[%s1434_s1 + $0x348] sm:$0xff]  ;;  %330 = vmatpush.msra.mxu3 %v254_v3  ;;  %v117_v12 = vld [vmem:[%s1434_s1 + $0x340] sm:$0xff]  ;;  %290 = vmatpush.msra.mxu1 %v253_v9  ;;  %v135_v6 = vld [vmem:[%s1434_s1 + $0x3d0] sm:$0xff] }
   0x6   :  { %v246_v5 = vld [vmem:[%s1434_s1 + $0x748] sm:$0xff]  ;;  %311 = vmatpush.msra.mxu2 %v118_v4  ;;  %v245_v13 = vld [vmem:[%s1434_s1 + $0x740] sm:$0xff]  ;;  %271 = vmatpush.msra.mxu0 %v117_v12  ;;  %v120_v4 = vld [vmem:[%s1434_s1 + $0x358] sm:$0xff] }
   0x7   :  { %v110_v10 = vld [vmem:[%s1434_s1 + $0x308] sm:$0xff]  ;;  %331 = vmatpush.msra.mxu3 %v246_v5  ;;  %v109_v16 = vld [vmem:[%s1434_s1 + $0x300] sm:$0xff]  ;;  %291 = vmatpush.msra.mxu1 %v245_v13  ;;  %v248_v5 = vld [vmem:[%s1434_s1 + $0x758] sm:$0xff] }
   0x8   :  { %v238_v11 = vld [vmem:[%s1434_s1 + $0x708] sm:$0xff]  ;;  %312 = vmatpush.msra.mxu2 %v110_v10  ;;  %v237_v17 = vld [vmem:[%s1434_s1 + $0x700] sm:$0xff]  ;;  %272 = vmatpush.msra.mxu0 %v109_v16  ;;  %v263_v7 = vld [vmem:[%s1434_s1 + $0x7d0] sm:$0xff] }
   0x9   :  { %v102_v14 = vld [vmem:[%s1434_s1 + $0x2c8] sm:$0xff]  ;;  %332 = vmatpush.msra.mxu3 %v238_v11  ;;  %v101_v20 = vld [vmem:[%s1434_s1 + $0x2c0] sm:$0xff]  ;;  %292 = vmatpush.msra.mxu1 %v237_v17  ;;  %v112_v8 = vld [vmem:[%s1434_s1 + $0x318] sm:$0xff] }
   0xa   :  { %v230_v15 = vld [vmem:[%s1434_s1 + $0x6c8] sm:$0xff]  ;;  %313 = vmatpush.msra.mxu2 %v102_v14  ;;  %v229_v21 = vld [vmem:[%s1434_s1 + $0x6c0] sm:$0xff]  ;;  %273 = vmatpush.msra.mxu0 %v101_v20  ;;  %v240_v9 = vld [vmem:[%s1434_s1 + $0x718] sm:$0xff] }
   0xb   :  { %v94_v18 = vld [vmem:[%s1434_s1 + $0x288] sm:$0xff]  ;;  %333 = vmatpush.msra.mxu3 %v230_v15  ;;  %v93_v24 = vld [vmem:[%s1434_s1 + $0x280] sm:$0xff]  ;;  %293 = vmatpush.msra.mxu1 %v229_v21  ;;  %v127_v10 = vld [vmem:[%s1434_s1 + $0x390] sm:$0xff] }
   0xc   :  { %v222_v19 = vld [vmem:[%s1434_s1 + $0x688] sm:$0xff]  ;;  %314 = vmatpush.msra.mxu2 %v94_v18  ;;  %v221_v25 = vld [vmem:[%s1434_s1 + $0x680] sm:$0xff]  ;;  %274 = vmatpush.msra.mxu0 %v93_v24  ;;  %v255_v11 = vld [vmem:[%s1434_s1 + $0x790] sm:$0xff] }
   0xd   :  { %v86_v22 = vld [vmem:[%s1434_s1 + $0x248] sm:$0xff]  ;;  %334 = vmatpush.msra.mxu3 %v222_v19  ;;  %v85_v28 = vld [vmem:[%s1434_s1 + $0x240] sm:$0xff]  ;;  %294 = vmatpush.msra.mxu1 %v221_v25  ;;  %v104_v12 = vld [vmem:[%s1434_s1 + $0x2d8] sm:$0xff] }
   0xe   :  { %v214_v23 = vld [vmem:[%s1434_s1 + $0x648] sm:$0xff]  ;;  %315 = vmatpush.msra.mxu2 %v86_v22  ;;  %v213_v29 = vld [vmem:[%s1434_s1 + $0x640] sm:$0xff]  ;;  %275 = vmatpush.msra.mxu0 %v85_v28  ;;  %v232_v13 = vld [vmem:[%s1434_s1 + $0x6d8] sm:$0xff] }
   0xf   :  { %v78_v26 = vld [vmem:[%s1434_s1 + $0x208] sm:$0xff]  ;;  %335 = vmatpush.msra.mxu3 %v214_v23  ;;  %v77_v32 = vld [vmem:[%s1434_s1 + $0x200] sm:$0xff]  ;;  %295 = vmatpush.msra.mxu1 %v213_v29  ;;  %v119_v14 = vld [vmem:[%s1434_s1 + $0x350] sm:$0xff] }
  0x10   :  { %v206_v27 = vld [vmem:[%s1434_s1 + $0x608] sm:$0xff]  ;;  %316 = vmatpush.msra.mxu2 %v78_v26  ;;  %v205_v33 = vld [vmem:[%s1434_s1 + $0x600] sm:$0xff]  ;;  %276 = vmatpush.msra.mxu0 %v77_v32  ;;  %v247_v15 = vld [vmem:[%s1434_s1 + $0x750] sm:$0xff] }
  0x11   :  { %v70_v30 = vld [vmem:[%s1434_s1 + $0x1c8] sm:$0xff]  ;;  %336 = vmatpush.msra.mxu3 %v206_v27  ;;  %v69_v36 = vld [vmem:[%s1434_s1 + $0x1c0] sm:$0xff]  ;;  %296 = vmatpush.msra.mxu1 %v205_v33  ;;  %v96_v16 = vld [vmem:[%s1434_s1 + $0x298] sm:$0xff] }
  0x12   :  { %v198_v31 = vld [vmem:[%s1434_s1 + $0x5c8] sm:$0xff]  ;;  %317 = vmatpush.msra.mxu2 %v70_v30  ;;  %v197_v37 = vld [vmem:[%s1434_s1 + $0x5c0] sm:$0xff]  ;;  %277 = vmatpush.msra.mxu0 %v69_v36  ;;  %v224_v17 = vld [vmem:[%s1434_s1 + $0x698] sm:$0xff] }
  0x13   :  { %v62_v34 = vld [vmem:[%s1434_s1 + $0x188] sm:$0xff]  ;;  %337 = vmatpush.msra.mxu3 %v198_v31  ;;  %v61_v40 = vld [vmem:[%s1434_s1 + $0x180] sm:$0xff]  ;;  %297 = vmatpush.msra.mxu1 %v197_v37  ;;  %v111_v18 = vld [vmem:[%s1434_s1 + $0x310] sm:$0xff] }
  0x14   :  { %v190_v35 = vld [vmem:[%s1434_s1 + $0x588] sm:$0xff]  ;;  %318 = vmatpush.msra.mxu2 %v62_v34  ;;  %v189_v41 = vld [vmem:[%s1434_s1 + $0x580] sm:$0xff]  ;;  %278 = vmatpush.msra.mxu0 %v61_v40  ;;  %v239_v19 = vld [vmem:[%s1434_s1 + $0x710] sm:$0xff] }
  0x15   :  { %v54_v38 = vld [vmem:[%s1434_s1 + $0x148] sm:$0xff]  ;;  %338 = vmatpush.msra.mxu3 %v190_v35  ;;  %v53_v44 = vld [vmem:[%s1434_s1 + $0x140] sm:$0xff]  ;;  %298 = vmatpush.msra.mxu1 %v189_v41  ;;  %v88_v20 = vld [vmem:[%s1434_s1 + $0x258] sm:$0xff] }
  0x16   :  { %v182_v39 = vld [vmem:[%s1434_s1 + $0x548] sm:$0xff]  ;;  %319 = vmatpush.msra.mxu2 %v54_v38  ;;  %v181_v45 = vld [vmem:[%s1434_s1 + $0x540] sm:$0xff]  ;;  %279 = vmatpush.msra.mxu0 %v53_v44  ;;  %v216_v21 = vld [vmem:[%s1434_s1 + $0x658] sm:$0xff] }
  0x17   :  { %v46_v42 = vld [vmem:[%s1434_s1 + $0x108] sm:$0xff]  ;;  %339 = vmatpush.msra.mxu3 %v182_v39  ;;  %v45_v48 = vld [vmem:[%s1434_s1 + $0x100] sm:$0xff]  ;;  %299 = vmatpush.msra.mxu1 %v181_v45  ;;  %v103_v22 = vld [vmem:[%s1434_s1 + $0x2d0] sm:$0xff] }
  0x18   :  { %v174_v43 = vld [vmem:[%s1434_s1 + $0x508] sm:$0xff]  ;;  %320 = vmatpush.msra.mxu2 %v46_v42  ;;  %v173_v49 = vld [vmem:[%s1434_s1 + $0x500] sm:$0xff]  ;;  %280 = vmatpush.msra.mxu0 %v45_v48  ;;  %v231_v23 = vld [vmem:[%s1434_s1 + $0x6d0] sm:$0xff] }
  0x19   :  { %v38_v46 = vld [vmem:[%s1434_s1 + $0xc8] sm:$0xff]  ;;  %340 = vmatpush.msra.mxu3 %v174_v43  ;;  %v37_v52 = vld [vmem:[%s1434_s1 + $0xc0] sm:$0xff]  ;;  %300 = vmatpush.msra.mxu1 %v173_v49  ;;  %v80_v24 = vld [vmem:[%s1434_s1 + $0x218] sm:$0xff] }
  0x1a   :  { %v166_v47 = vld [vmem:[%s1434_s1 + $0x4c8] sm:$0xff]  ;;  %321 = vmatpush.msra.mxu2 %v38_v46  ;;  %v165_v53 = vld [vmem:[%s1434_s1 + $0x4c0] sm:$0xff]  ;;  %281 = vmatpush.msra.mxu0 %v37_v52  ;;  %v208_v25 = vld [vmem:[%s1434_s1 + $0x618] sm:$0xff] }
  0x1b   :  { %v30_v50 = vld [vmem:[%s1434_s1 + $0x88] sm:$0xff]  ;;  %341 = vmatpush.msra.mxu3 %v166_v47  ;;  %v29_v56 = vld [vmem:[%s1434_s1 + $0x80] sm:$0xff]  ;;  %301 = vmatpush.msra.mxu1 %v165_v53  ;;  %v95_v26 = vld [vmem:[%s1434_s1 + $0x290] sm:$0xff] }
  0x1c   :  { %v158_v51 = vld [vmem:[%s1434_s1 + $0x488] sm:$0xff]  ;;  %322 = vmatpush.msra.mxu2 %v30_v50  ;;  %v157_v57 = vld [vmem:[%s1434_s1 + $0x480] sm:$0xff]  ;;  %282 = vmatpush.msra.mxu0 %v29_v56  ;;  %v223_v27 = vld [vmem:[%s1434_s1 + $0x690] sm:$0xff] }
  0x1d   :  { %v22_v54 = vld [vmem:[%s1434_s1 + $0x48] sm:$0xff]  ;;  %342 = vmatpush.msra.mxu3 %v158_v51  ;;  %302 = vmatpush.msra.mxu1 %v157_v57  ;;  %v21_v62 = vld [vmem:[%s1434_s1 + $0x40] sm:$0xff]  ;;  %v72_v28 = vld [vmem:[%s1434_s1 + $0x1d8] sm:$0xff] }
  0x1e   :  { %v150_v55 = vld [vmem:[%s1434_s1 + $0x448] sm:$0xff]  ;;  %323 = vmatpush.msra.mxu2 %v22_v54  ;;  %v149_v63 = vld [vmem:[%s1434_s1 + $0x440] sm:$0xff]  ;;  %283 = vmatpush.msra.mxu0 %v21_v62  ;;  %v200_v29 = vld [vmem:[%s1434_s1 + $0x5d8] sm:$0xff] }
  0x1f   :  { %v14_v58 = vld [vmem:[%s1434_s1 + $0x8] sm:$0xff]  ;;  %343 = vmatpush.msra.mxu3 %v150_v55  ;;  %v13_v2 = vld [vmem:[%s1434_s1] sm:$0xff]  ;;  %303 = vmatpush.msra.mxu1 %v149_v63  ;;  %v87_v30 = vld [vmem:[%s1434_s1 + $0x250] sm:$0xff] }
  0x20   :  { %v142_v59 = vld [vmem:[%s1434_s1 + $0x408] sm:$0xff]  ;;  %324 = vmatpush.msra.mxu2 %v14_v58  ;;  %v141_v3 = vld [vmem:[%s1434_s1 + $0x400] sm:$0xff]  ;;  %284 = vmatpush.msra.mxu0 %v13_v2  ;;  %v215_v31 = vld [vmem:[%s1434_s1 + $0x650] sm:$0xff] }
  0x21   :  { %344 = vmatpush.msra.mxu3 %v142_v59  ;;  %304 = vmatpush.msra.mxu1 %v141_v3  ;;  %v64_v32 = vld [vmem:[%s1434_s1 + $0x198] sm:$0xff]  ;;  %v79_v34 = vld [vmem:[%s1434_s1 + $0x210] sm:$0xff]  ;;  %v985_v58 = vld [vmem:[%s1435_s0] sm:$0xff] }
  0x22   :  { %389 = vmatpush.msrb.mxu2 %v136_v60  ;;  %349 = vmatpush.msrb.mxu0 %v135_v6  ;;  %v192_v33 = vld [vmem:[%s1434_s1 + $0x598] sm:$0xff]  ;;  %v207_v35 = vld [vmem:[%s1434_s1 + $0x610] sm:$0xff]  ;;  %v990_v59 = vld [vmem:[%s1435_s0 + $0x8] sm:$0xff] }
  0x23   :  { %409 = vmatpush.msrb.mxu3 %v264_v61  ;;  %369 = vmatpush.msrb.mxu1 %v263_v7  ;;  %v56_v36 = vld [vmem:[%s1434_s1 + $0x158] sm:$0xff]  ;;  %v71_v38 = vld [vmem:[%s1434_s1 + $0x1d0] sm:$0xff]  ;;  %v138_v60 = vld [vmem:[%s1434_s1 + $0x3e8] sm:$0xff] }
  0x24   :  { %390 = vmatpush.msrb.mxu2 %v128_v0  ;;  %350 = vmatpush.msrb.mxu0 %v127_v10  ;;  %v184_v37 = vld [vmem:[%s1434_s1 + $0x558] sm:$0xff]  ;;  %v199_v39 = vld [vmem:[%s1434_s1 + $0x5d0] sm:$0xff]  ;;  %v266_v61 = vld [vmem:[%s1434_s1 + $0x7e8] sm:$0xff] }
  0x25   :  { %410 = vmatpush.msrb.mxu3 %v256_v1  ;;  %370 = vmatpush.msrb.mxu1 %v255_v11  ;;  %v48_v40 = vld [vmem:[%s1434_s1 + $0x118] sm:$0xff]  ;;  %v63_v42 = vld [vmem:[%s1434_s1 + $0x190] sm:$0xff]  ;;  %v130_v0 = vld [vmem:[%s1434_s1 + $0x3a8] sm:$0xff] }
  0x26   :  { %391 = vmatpush.msrb.mxu2 %v120_v4  ;;  %351 = vmatpush.msrb.mxu0 %v119_v14  ;;  %v176_v41 = vld [vmem:[%s1434_s1 + $0x518] sm:$0xff]  ;;  %v191_v43 = vld [vmem:[%s1434_s1 + $0x590] sm:$0xff]  ;;  %v258_v1 = vld [vmem:[%s1434_s1 + $0x7a8] sm:$0xff] }
  0x27   :  { %411 = vmatpush.msrb.mxu3 %v248_v5  ;;  %371 = vmatpush.msrb.mxu1 %v247_v15  ;;  %v40_v44 = vld [vmem:[%s1434_s1 + $0xd8] sm:$0xff]  ;;  %v55_v46 = vld [vmem:[%s1434_s1 + $0x150] sm:$0xff]  ;;  %v122_v4 = vld [vmem:[%s1434_s1 + $0x368] sm:$0xff] }
  0x28   :  { %392 = vmatpush.msrb.mxu2 %v112_v8  ;;  %352 = vmatpush.msrb.mxu0 %v111_v18  ;;  %v168_v45 = vld [vmem:[%s1434_s1 + $0x4d8] sm:$0xff]  ;;  %v183_v47 = vld [vmem:[%s1434_s1 + $0x550] sm:$0xff]  ;;  %v250_v5 = vld [vmem:[%s1434_s1 + $0x768] sm:$0xff] }
  0x29   :  { %412 = vmatpush.msrb.mxu3 %v240_v9  ;;  %372 = vmatpush.msrb.mxu1 %v239_v19  ;;  %v32_v48 = vld [vmem:[%s1434_s1 + $0x98] sm:$0xff]  ;;  %v47_v50 = vld [vmem:[%s1434_s1 + $0x110] sm:$0xff]  ;;  %v137_v8 = vld [vmem:[%s1434_s1 + $0x3e0] sm:$0xff] }
  0x2a   :  { %393 = vmatpush.msrb.mxu2 %v104_v12  ;;  %353 = vmatpush.msrb.mxu0 %v103_v22  ;;  %v160_v49 = vld [vmem:[%s1434_s1 + $0x498] sm:$0xff]  ;;  %v175_v51 = vld [vmem:[%s1434_s1 + $0x510] sm:$0xff]  ;;  %v265_v9 = vld [vmem:[%s1434_s1 + $0x7e0] sm:$0xff] }
  0x2b   :  { %413 = vmatpush.msrb.mxu3 %v232_v13  ;;  %373 = vmatpush.msrb.mxu1 %v231_v23  ;;  %v24_v52 = vld [vmem:[%s1434_s1 + $0x58] sm:$0xff]  ;;  %v39_v54 = vld [vmem:[%s1434_s1 + $0xd0] sm:$0xff]  ;;  %v114_v10 = vld [vmem:[%s1434_s1 + $0x328] sm:$0xff] }
  0x2c   :  { %394 = vmatpush.msrb.mxu2 %v96_v16  ;;  %354 = vmatpush.msrb.mxu0 %v95_v26  ;;  %v152_v53 = vld [vmem:[%s1434_s1 + $0x458] sm:$0xff]  ;;  %v167_v55 = vld [vmem:[%s1434_s1 + $0x4d0] sm:$0xff]  ;;  %v242_v11 = vld [vmem:[%s1434_s1 + $0x728] sm:$0xff] }
  0x2d   :  { %414 = vmatpush.msrb.mxu3 %v224_v17  ;;  %374 = vmatpush.msrb.mxu1 %v223_v27  ;;  %v16_v56 = vld [vmem:[%s1434_s1 + $0x18] sm:$0xff]  ;;  %v31_v62 = vld [vmem:[%s1434_s1 + $0x90] sm:$0xff]  ;;  %v129_v12 = vld [vmem:[%s1434_s1 + $0x3a0] sm:$0xff] }
  0x2e   :  { %395 = vmatpush.msrb.mxu2 %v88_v20  ;;  %355 = vmatpush.msrb.mxu0 %v87_v30  ;;  %v144_v57 = vld [vmem:[%s1434_s1 + $0x418] sm:$0xff]  ;;  %v159_v63 = vld [vmem:[%s1434_s1 + $0x490] sm:$0xff]  ;;  %v257_v13 = vld [vmem:[%s1434_s1 + $0x7a0] sm:$0xff] }
  0x2f   :  { %415 = vmatpush.msrb.mxu3 %v216_v21  ;;  %375 = vmatpush.msrb.mxu1 %v215_v31  ;;  %v23_v2 = vld [vmem:[%s1434_s1 + $0x50] sm:$0xff]  ;;  %v106_v14 = vld [vmem:[%s1434_s1 + $0x2e8] sm:$0xff]  ;;  %v121_v16 = vld [vmem:[%s1434_s1 + $0x360] sm:$0xff] }
  0x30   :  { %396 = vmatpush.msrb.mxu2 %v80_v24  ;;  %356 = vmatpush.msrb.mxu0 %v79_v34  ;;  %v151_v3 = vld [vmem:[%s1434_s1 + $0x450] sm:$0xff]  ;;  %v234_v15 = vld [vmem:[%s1434_s1 + $0x6e8] sm:$0xff]  ;;  %v249_v17 = vld [vmem:[%s1434_s1 + $0x760] sm:$0xff] }
  0x31   :  { %416 = vmatpush.msrb.mxu3 %v208_v25  ;;  %376 = vmatpush.msrb.mxu1 %v207_v35  ;;  %v15_v6 = vld [vmem:[%s1434_s1 + $0x10] sm:$0xff]  ;;  %v98_v18 = vld [vmem:[%s1434_s1 + $0x2a8] sm:$0xff]  ;;  %v113_v20 = vld [vmem:[%s1434_s1 + $0x320] sm:$0xff] }
  0x32   :  { %397 = vmatpush.msrb.mxu2 %v72_v28  ;;  %357 = vmatpush.msrb.mxu0 %v71_v38  ;;  %v143_v7 = vld [vmem:[%s1434_s1 + $0x410] sm:$0xff]  ;;  %v226_v19 = vld [vmem:[%s1434_s1 + $0x6a8] sm:$0xff]  ;;  %v241_v21 = vld [vmem:[%s1434_s1 + $0x720] sm:$0xff] }
  0x33   :  { %417 = vmatpush.msrb.mxu3 %v200_v29  ;;  %377 = vmatpush.msrb.mxu1 %v199_v39  ;;  %v90_v22 = vld [vmem:[%s1434_s1 + $0x268] sm:$0xff]  ;;  %v105_v24 = vld [vmem:[%s1434_s1 + $0x2e0] sm:$0xff] }
  0x34   :  { %398 = vmatpush.msrb.mxu2 %v64_v32  ;;  %358 = vmatpush.msrb.mxu0 %v63_v42  ;;  %v218_v23 = vld [vmem:[%s1434_s1 + $0x668] sm:$0xff]  ;;  %v233_v25 = vld [vmem:[%s1434_s1 + $0x6e0] sm:$0xff] }
  0x35   :  { %418 = vmatpush.msrb.mxu3 %v192_v33  ;;  %378 = vmatpush.msrb.mxu1 %v191_v43  ;;  %v82_v26 = vld [vmem:[%s1434_s1 + $0x228] sm:$0xff]  ;;  %v97_v28 = vld [vmem:[%s1434_s1 + $0x2a0] sm:$0xff] }
  0x36   :  { %399 = vmatpush.msrb.mxu2 %v56_v36  ;;  %359 = vmatpush.msrb.mxu0 %v55_v46  ;;  %v210_v27 = vld [vmem:[%s1434_s1 + $0x628] sm:$0xff]  ;;  %v225_v29 = vld [vmem:[%s1434_s1 + $0x6a0] sm:$0xff] }
  0x37   :  { %419 = vmatpush.msrb.mxu3 %v184_v37  ;;  %379 = vmatpush.msrb.mxu1 %v183_v47  ;;  %v74_v30 = vld [vmem:[%s1434_s1 + $0x1e8] sm:$0xff]  ;;  %v89_v32 = vld [vmem:[%s1434_s1 + $0x260] sm:$0xff] }
  0x38   :  { %400 = vmatpush.msrb.mxu2 %v48_v40  ;;  %360 = vmatpush.msrb.mxu0 %v47_v50  ;;  %v202_v31 = vld [vmem:[%s1434_s1 + $0x5e8] sm:$0xff]  ;;  %v217_v33 = vld [vmem:[%s1434_s1 + $0x660] sm:$0xff] }
  0x39   :  { %420 = vmatpush.msrb.mxu3 %v176_v41  ;;  %380 = vmatpush.msrb.mxu1 %v175_v51  ;;  %v66_v34 = vld [vmem:[%s1434_s1 + $0x1a8] sm:$0xff]  ;;  %v81_v36 = vld [vmem:[%s1434_s1 + $0x220] sm:$0xff] }
  0x3a   :  { %401 = vmatpush.msrb.mxu2 %v40_v44  ;;  %361 = vmatpush.msrb.mxu0 %v39_v54  ;;  %v194_v35 = vld [vmem:[%s1434_s1 + $0x5a8] sm:$0xff]  ;;  %v209_v37 = vld [vmem:[%s1434_s1 + $0x620] sm:$0xff] }
  0x3b   :  { %421 = vmatpush.msrb.mxu3 %v168_v45  ;;  %381 = vmatpush.msrb.mxu1 %v167_v55  ;;  %v58_v38 = vld [vmem:[%s1434_s1 + $0x168] sm:$0xff]  ;;  %v73_v40 = vld [vmem:[%s1434_s1 + $0x1e0] sm:$0xff] }
  0x3c   :  { %402 = vmatpush.msrb.mxu2 %v32_v48  ;;  %345 = vmatmul.f32.vlgmr.msra.gmra.mxu3 %v990_v59  ;;  %v186_v39 = vld [vmem:[%s1434_s1 + $0x568] sm:$0xff]  ;;  %v201_v41 = vld [vmem:[%s1434_s1 + $0x5e0] sm:$0xff] }
  0x3d   :  { %422 = vmatpush.msrb.mxu3 %v160_v49  ;;  %325 = vmatmul.f32.vlgmr.msra.gmra.mxu2 %v985_v58  ;;  %v50_v42 = vld [vmem:[%s1434_s1 + $0x128] sm:$0xff]  ;;  %v65_v44 = vld [vmem:[%s1434_s1 + $0x1a0] sm:$0xff] }
  0x3e   :  { %403 = vmatpush.msrb.mxu2 %v24_v52  ;;  %362 = vmatpush.msrb.mxu0 %v31_v62  ;;  %v178_v43 = vld [vmem:[%s1434_s1 + $0x528] sm:$0xff]  ;;  %v193_v45 = vld [vmem:[%s1434_s1 + $0x5a0] sm:$0xff]  ;;  %v140_v62 = vld [vmem:[%s1434_s1 + $0x3f8] sm:$0xff] }
  0x3f   :  { %423 = vmatpush.msrb.mxu3 %v152_v53  ;;  %382 = vmatpush.msrb.mxu1 %v159_v63  ;;  %v42_v46 = vld [vmem:[%s1434_s1 + $0xe8] sm:$0xff]  ;;  %v57_v48 = vld [vmem:[%s1434_s1 + $0x160] sm:$0xff]  ;;  %v268_v63 = vld [vmem:[%s1434_s1 + $0x7f8] sm:$0xff] }
  0x40   :  { %404 = vmatpush.msrb.mxu2 %v16_v56  ;;  %363 = vmatpush.msrb.mxu0 %v23_v2  ;;  %v170_v47 = vld [vmem:[%s1434_s1 + $0x4e8] sm:$0xff]  ;;  %v185_v49 = vld [vmem:[%s1434_s1 + $0x560] sm:$0xff]  ;;  %v132_v2 = vld [vmem:[%s1434_s1 + $0x3b8] sm:$0xff] }
  0x41   :  { %424 = vmatpush.msrb.mxu3 %v144_v57  ;;  %383 = vmatpush.msrb.mxu1 %v151_v3  ;;  %v34_v50 = vld [vmem:[%s1434_s1 + $0xa8] sm:$0xff]  ;;  %v49_v52 = vld [vmem:[%s1434_s1 + $0x120] sm:$0xff]  ;;  %v260_v3 = vld [vmem:[%s1434_s1 + $0x7b8] sm:$0xff] }
  0x42   :  { %469 = vmatpush.msra.mxu2 %v138_v60  ;;  %364 = vmatpush.msrb.mxu0 %v15_v6  ;;  %v162_v51 = vld [vmem:[%s1434_s1 + $0x4a8] sm:$0xff]  ;;  %v177_v53 = vld [vmem:[%s1434_s1 + $0x520] sm:$0xff]  ;;  %v124_v6 = vld [vmem:[%s1434_s1 + $0x378] sm:$0xff] }
  0x43   :  { %489 = vmatpush.msra.mxu3 %v266_v61  ;;  %384 = vmatpush.msrb.mxu1 %v143_v7  ;;  %v26_v54 = vld [vmem:[%s1434_s1 + $0x68] sm:$0xff]  ;;  %v41_v56 = vld [vmem:[%s1434_s1 + $0xe0] sm:$0xff]  ;;  %v252_v7 = vld [vmem:[%s1434_s1 + $0x778] sm:$0xff] }
  0x44   :  { %470 = vmatpush.msra.mxu2 %v130_v0  ;;  %285 = vmatmul.f32.vlgmr.msra.gmra.mxu0 %v985_v58  ;;  %v154_v55 = vld [vmem:[%s1434_s1 + $0x468] sm:$0xff]  ;;  %v169_v57 = vld [vmem:[%s1434_s1 + $0x4e0] sm:$0xff] }
  0x45   :  { %490 = vmatpush.msra.mxu3 %v258_v1  ;;  %305 = vmatmul.f32.vlgmr.msra.gmra.mxu1 %v990_v59  ;;  %v18_v60 = vld [vmem:[%s1434_s1 + $0x28] sm:$0xff]  ;;  %v33_v0 = vld [vmem:[%s1434_s1 + $0xa0] sm:$0xff] }
  0x46   :  { %471 = vmatpush.msra.mxu2 %v122_v4  ;;  %429 = vmatpush.msra.mxu0 %v137_v8  ;;  %v146_v61 = vld [vmem:[%s1434_s1 + $0x428] sm:$0xff]  ;;  %v161_v1 = vld [vmem:[%s1434_s1 + $0x4a0] sm:$0xff] }
  0x47   :  { %491 = vmatpush.msra.mxu3 %v250_v5  ;;  %449 = vmatpush.msra.mxu1 %v265_v9  ;;  %v25_v4 = vld [vmem:[%s1434_s1 + $0x60] sm:$0xff] }
  0x48   :  { %472 = vmatpush.msra.mxu2 %v114_v10  ;;  %430 = vmatpush.msra.mxu0 %v129_v12  ;;  %v153_v5 = vld [vmem:[%s1434_s1 + $0x460] sm:$0xff]  ;;  %v139_v10 = vld [vmem:[%s1434_s1 + $0x3f0] sm:$0xff]  ;;  %v116_v12 = vld [vmem:[%s1434_s1 + $0x338] sm:$0xff] }
  0x49   :  { %492 = vmatpush.msra.mxu3 %v242_v11  ;;  %450 = vmatpush.msra.mxu1 %v257_v13  ;;  %v17_v8 = vld [vmem:[%s1434_s1 + $0x20] sm:$0xff]  ;;  %v267_v11 = vld [vmem:[%s1434_s1 + $0x7f0] sm:$0xff]  ;;  %v244_v13 = vld [vmem:[%s1434_s1 + $0x738] sm:$0xff] }
  0x4a   :  { %473 = vmatpush.msra.mxu2 %v106_v14  ;;  %431 = vmatpush.msra.mxu0 %v121_v16  ;;  %v145_v9 = vld [vmem:[%s1434_s1 + $0x420] sm:$0xff]  ;;  %v131_v14 = vld [vmem:[%s1434_s1 + $0x3b0] sm:$0xff]  ;;  %v108_v16 = vld [vmem:[%s1434_s1 + $0x2f8] sm:$0xff] }
  0x4b   :  { %493 = vmatpush.msra.mxu3 %v234_v15  ;;  %451 = vmatpush.msra.mxu1 %v249_v17  ;;  %v259_v15 = vld [vmem:[%s1434_s1 + $0x7b0] sm:$0xff]  ;;  %v236_v17 = vld [vmem:[%s1434_s1 + $0x6f8] sm:$0xff] }
  0x4c   :  { %474 = vmatpush.msra.mxu2 %v98_v18  ;;  %432 = vmatpush.msra.mxu0 %v113_v20  ;;  %v123_v18 = vld [vmem:[%s1434_s1 + $0x370] sm:$0xff]  ;;  %v100_v20 = vld [vmem:[%s1434_s1 + $0x2b8] sm:$0xff] }
  0x4d   :  { %494 = vmatpush.msra.mxu3 %v226_v19  ;;  %452 = vmatpush.msra.mxu1 %v241_v21  ;;  %v251_v19 = vld [vmem:[%s1434_s1 + $0x770] sm:$0xff]  ;;  %v228_v21 = vld [vmem:[%s1434_s1 + $0x6b8] sm:$0xff] }
  0x4e   :  { %475 = vmatpush.msra.mxu2 %v90_v22  ;;  %433 = vmatpush.msra.mxu0 %v105_v24  ;;  %v115_v22 = vld [vmem:[%s1434_s1 + $0x330] sm:$0xff]  ;;  %v92_v24 = vld [vmem:[%s1434_s1 + $0x278] sm:$0xff] }
  0x4f   :  { %495 = vmatpush.msra.mxu3 %v218_v23  ;;  %453 = vmatpush.msra.mxu1 %v233_v25  ;;  %v243_v23 = vld [vmem:[%s1434_s1 + $0x730] sm:$0xff]  ;;  %v220_v25 = vld [vmem:[%s1434_s1 + $0x678] sm:$0xff] }
  0x50   :  { %476 = vmatpush.msra.mxu2 %v82_v26  ;;  %434 = vmatpush.msra.mxu0 %v97_v28  ;;  %v107_v26 = vld [vmem:[%s1434_s1 + $0x2f0] sm:$0xff]  ;;  %v84_v28 = vld [vmem:[%s1434_s1 + $0x238] sm:$0xff] }
  0x51   :  { %496 = vmatpush.msra.mxu3 %v210_v27  ;;  %454 = vmatpush.msra.mxu1 %v225_v29  ;;  %v235_v27 = vld [vmem:[%s1434_s1 + $0x6f0] sm:$0xff]  ;;  %v212_v29 = vld [vmem:[%s1434_s1 + $0x638] sm:$0xff] }
  0x52   :  { %477 = vmatpush.msra.mxu2 %v74_v30  ;;  %435 = vmatpush.msra.mxu0 %v89_v32  ;;  %v99_v30 = vld [vmem:[%s1434_s1 + $0x2b0] sm:$0xff]  ;;  %v76_v32 = vld [vmem:[%s1434_s1 + $0x1f8] sm:$0xff] }
  0x53   :  { %497 = vmatpush.msra.mxu3 %v202_v31  ;;  %455 = vmatpush.msra.mxu1 %v217_v33  ;;  %v227_v31 = vld [vmem:[%s1434_s1 + $0x6b0] sm:$0xff]  ;;  %v204_v33 = vld [vmem:[%s1434_s1 + $0x5f8] sm:$0xff] }
  0x54   :  { %478 = vmatpush.msra.mxu2 %v66_v34  ;;  %436 = vmatpush.msra.mxu0 %v81_v36  ;;  %v91_v34 = vld [vmem:[%s1434_s1 + $0x270] sm:$0xff]  ;;  %v68_v36 = vld [vmem:[%s1434_s1 + $0x1b8] sm:$0xff] }
  0x55   :  { %498 = vmatpush.msra.mxu3 %v194_v35  ;;  %456 = vmatpush.msra.mxu1 %v209_v37  ;;  %v219_v35 = vld [vmem:[%s1434_s1 + $0x670] sm:$0xff]  ;;  %v196_v37 = vld [vmem:[%s1434_s1 + $0x5b8] sm:$0xff] }
  0x56   :  { %479 = vmatpush.msra.mxu2 %v58_v38  ;;  %437 = vmatpush.msra.mxu0 %v73_v40  ;;  %v83_v38 = vld [vmem:[%s1434_s1 + $0x230] sm:$0xff]  ;;  %v60_v40 = vld [vmem:[%s1434_s1 + $0x178] sm:$0xff] }
  0x57   :  { %499 = vmatpush.msra.mxu3 %v186_v39  ;;  %457 = vmatpush.msra.mxu1 %v201_v41  ;;  %v211_v39 = vld [vmem:[%s1434_s1 + $0x630] sm:$0xff]  ;;  %v188_v41 = vld [vmem:[%s1434_s1 + $0x578] sm:$0xff] }
  0x58   :  { %480 = vmatpush.msra.mxu2 %v50_v42  ;;  %438 = vmatpush.msra.mxu0 %v65_v44  ;;  %v75_v42 = vld [vmem:[%s1434_s1 + $0x1f0] sm:$0xff]  ;;  %v52_v44 = vld [vmem:[%s1434_s1 + $0x138] sm:$0xff] }
  0x59   :  { %500 = vmatpush.msra.mxu3 %v178_v43  ;;  %458 = vmatpush.msra.mxu1 %v193_v45  ;;  %v203_v43 = vld [vmem:[%s1434_s1 + $0x5f0] sm:$0xff]  ;;  %v180_v45 = vld [vmem:[%s1434_s1 + $0x538] sm:$0xff] }
  0x5a   :  { %481 = vmatpush.msra.mxu2 %v42_v46  ;;  %439 = vmatpush.msra.mxu0 %v57_v48  ;;  %v67_v46 = vld [vmem:[%s1434_s1 + $0x1b0] sm:$0xff]  ;;  %v44_v48 = vld [vmem:[%s1434_s1 + $0xf8] sm:$0xff] }
  0x5b   :  { %501 = vmatpush.msra.mxu3 %v170_v47  ;;  %459 = vmatpush.msra.mxu1 %v185_v49  ;;  %v195_v47 = vld [vmem:[%s1434_s1 + $0x5b0] sm:$0xff]  ;;  %v172_v49 = vld [vmem:[%s1434_s1 + $0x4f8] sm:$0xff] }
  0x5c   :  { %482 = vmatpush.msra.mxu2 %v34_v50  ;;  %440 = vmatpush.msra.mxu0 %v49_v52  ;;  %v59_v50 = vld [vmem:[%s1434_s1 + $0x170] sm:$0xff]  ;;  %v36_v52 = vld [vmem:[%s1434_s1 + $0xb8] sm:$0xff] }
  0x5d   :  { %502 = vmatpush.msra.mxu3 %v162_v51  ;;  %460 = vmatpush.msra.mxu1 %v177_v53  ;;  %v187_v51 = vld [vmem:[%s1434_s1 + $0x570] sm:$0xff]  ;;  %v164_v53 = vld [vmem:[%s1434_s1 + $0x4b8] sm:$0xff] }
  0x5e   :  { %483 = vmatpush.msra.mxu2 %v26_v54  ;;  %441 = vmatpush.msra.mxu0 %v41_v56  ;;  %v51_v54 = vld [vmem:[%s1434_s1 + $0x130] sm:$0xff]  ;;  %v28_v56 = vld [vmem:[%s1434_s1 + $0x78] sm:$0xff] }
  0x5f   :  { %503 = vmatpush.msra.mxu3 %v154_v55  ;;  %461 = vmatpush.msra.mxu1 %v169_v57  ;;  %v179_v55 = vld [vmem:[%s1434_s1 + $0x530] sm:$0xff]  ;;  %v156_v57 = vld [vmem:[%s1434_s1 + $0x478] sm:$0xff] }
  0x60   :  { %484 = vmatpush.msra.mxu2 %v18_v60  ;;  %425 = vmatmul.f32.vlgmr.msrb.gmra.mxu3 %v990_v59  ;;  %v43_v60 = vld [vmem:[%s1434_s1 + $0xf0] sm:$0xff] }
  0x61   :  { %504 = vmatpush.msra.mxu3 %v146_v61  ;;  %405 = vmatmul.f32.vlgmr.msrb.gmra.mxu2 %v985_v58  ;;  %v171_v61 = vld [vmem:[%s1434_s1 + $0x4f0] sm:$0xff] }
  0x62   :  { %549 = vmatpush.msrb.mxu2 %v140_v62  ;;  %442 = vmatpush.msra.mxu0 %v33_v0  ;;  %v20_v62 = vld [vmem:[%s1434_s1 + $0x38] sm:$0xff]  ;;  %v35_v0 = vld [vmem:[%s1434_s1 + $0xb0] sm:$0xff] }
  0x63   :  { %569 = vmatpush.msrb.mxu3 %v268_v63  ;;  %462 = vmatpush.msra.mxu1 %v161_v1  ;;  %v148_v63 = vld [vmem:[%s1434_s1 + $0x438] sm:$0xff]  ;;  %v163_v1 = vld [vmem:[%s1434_s1 + $0x4b0] sm:$0xff] }
  0x64   :  { %550 = vmatpush.msrb.mxu2 %v132_v2  ;;  %443 = vmatpush.msra.mxu0 %v25_v4  ;;  %v27_v2 = vld [vmem:[%s1434_s1 + $0x70] sm:$0xff] }
  0x65   :  { %570 = vmatpush.msrb.mxu3 %v260_v3  ;;  %463 = vmatpush.msra.mxu1 %v153_v5  ;;  %v155_v3 = vld [vmem:[%s1434_s1 + $0x470] sm:$0xff] }
  0x66   :  { %551 = vmatpush.msrb.mxu2 %v124_v6  ;;  %444 = vmatpush.msra.mxu0 %v17_v8  ;;  %v19_v4 = vld [vmem:[%s1434_s1 + $0x30] sm:$0xff] }
  0x67   :  { %571 = vmatpush.msrb.mxu3 %v252_v7  ;;  %464 = vmatpush.msra.mxu1 %v145_v9  ;;  %v147_v5 = vld [vmem:[%s1434_s1 + $0x430] sm:$0xff] }
  0x68   :  { %365 = vmatmul.f32.vlgmr.msrb.gmra.mxu0 %v985_v58  ;;  %385 = vmatmul.f32.vlgmr.msrb.gmra.mxu1 %v990_v59 }
  0x69   :  { %509 = vmatpush.msrb.mxu0 %v139_v10  ;;  %529 = vmatpush.msrb.mxu1 %v267_v11 }
  0x6a   :  { %552 = vmatpush.msrb.mxu2 %v116_v12  ;;  %572 = vmatpush.msrb.mxu3 %v244_v13 }
  0x6b   :  { %510 = vmatpush.msrb.mxu0 %v131_v14  ;;  %530 = vmatpush.msrb.mxu1 %v259_v15 }
  0x6c   :  { %553 = vmatpush.msrb.mxu2 %v108_v16  ;;  %573 = vmatpush.msrb.mxu3 %v236_v17 }
  0x6d   :  { %511 = vmatpush.msrb.mxu0 %v123_v18  ;;  %531 = vmatpush.msrb.mxu1 %v251_v19 }
  0x6e   :  { %554 = vmatpush.msrb.mxu2 %v100_v20  ;;  %574 = vmatpush.msrb.mxu3 %v228_v21 }
  0x6f   :  { %512 = vmatpush.msrb.mxu0 %v115_v22  ;;  %532 = vmatpush.msrb.mxu1 %v243_v23 }
  0x70   :  { %555 = vmatpush.msrb.mxu2 %v92_v24  ;;  %575 = vmatpush.msrb.mxu3 %v220_v25 }
  0x71   :  { %513 = vmatpush.msrb.mxu0 %v107_v26  ;;  %533 = vmatpush.msrb.mxu1 %v235_v27 }
  0x72   :  { %556 = vmatpush.msrb.mxu2 %v84_v28  ;;  %576 = vmatpush.msrb.mxu3 %v212_v29 }
  0x73   :  { %514 = vmatpush.msrb.mxu0 %v99_v30  ;;  %534 = vmatpush.msrb.mxu1 %v227_v31 }
  0x74   :  { %557 = vmatpush.msrb.mxu2 %v76_v32  ;;  %577 = vmatpush.msrb.mxu3 %v204_v33 }
  0x75   :  { %515 = vmatpush.msrb.mxu0 %v91_v34  ;;  %535 = vmatpush.msrb.mxu1 %v219_v35 }
  0x76   :  { %558 = vmatpush.msrb.mxu2 %v68_v36  ;;  %578 = vmatpush.msrb.mxu3 %v196_v37 }
  0x77   :  { %516 = vmatpush.msrb.mxu0 %v83_v38  ;;  %536 = vmatpush.msrb.mxu1 %v211_v39 }
  0x78   :  { %559 = vmatpush.msrb.mxu2 %v60_v40  ;;  %579 = vmatpush.msrb.mxu3 %v188_v41 }
  0x79   :  { %517 = vmatpush.msrb.mxu0 %v75_v42  ;;  %537 = vmatpush.msrb.mxu1 %v203_v43 }
  0x7a   :  { %560 = vmatpush.msrb.mxu2 %v52_v44  ;;  %580 = vmatpush.msrb.mxu3 %v180_v45 }
  0x7b   :  { %485 = vmatmul.f32.vlgmr.msra.gmra.mxu2 %v985_v58  ;;  %505 = vmatmul.f32.vlgmr.msra.gmra.mxu3 %v990_v59 }
  0x7c   :  { %518 = vmatpush.msrb.mxu0 %v67_v46  ;;  %538 = vmatpush.msrb.mxu1 %v195_v47 }
  0x7d   :  { %561 = vmatpush.msrb.mxu2 %v44_v48  ;;  %581 = vmatpush.msrb.mxu3 %v172_v49 }
  0x7e   :  { %519 = vmatpush.msrb.mxu0 %v59_v50  ;;  %539 = vmatpush.msrb.mxu1 %v187_v51 }
  0x7f   :  { %562 = vmatpush.msrb.mxu2 %v36_v52  ;;  %582 = vmatpush.msrb.mxu3 %v164_v53 }
  0x80   :  { %520 = vmatpush.msrb.mxu0 %v51_v54  ;;  %540 = vmatpush.msrb.mxu1 %v179_v55 }
  0x81   :  { %563 = vmatpush.msrb.mxu2 %v28_v56  ;;  %583 = vmatpush.msrb.mxu3 %v156_v57 }
  0x82   :  { %445 = vmatmul.f32.vlgmr.msra.gmra.mxu0 %v985_v58  ;;  %465 = vmatmul.f32.vlgmr.msra.gmra.mxu1 %v990_v59 }
  0x83   :  { %521 = vmatpush.msrb.mxu0 %v43_v60  ;;  %541 = vmatpush.msrb.mxu1 %v171_v61 }
  0x84   :  { %564 = vmatpush.msrb.mxu2 %v20_v62  ;;  %584 = vmatpush.msrb.mxu3 %v148_v63 }
  0x85   :  { %565 = vmatmul.f32.vlgmr.msrb.gmra.mxu2 %v985_v58  ;;  %585 = vmatmul.f32.vlgmr.msrb.gmra.mxu3 %v990_v59 }
  0x86   :  { %522 = vmatpush.msrb.mxu0 %v35_v0  ;;  %542 = vmatpush.msrb.mxu1 %v163_v1 }
  0x88   :  { %523 = vmatpush.msrb.mxu0 %v27_v2  ;;  %543 = vmatpush.msrb.mxu1 %v155_v3 }
  0x8a   :  { %524 = vmatpush.msrb.mxu0 %v19_v4  ;;  %544 = vmatpush.msrb.mxu1 %v147_v5 }
  0x8b   :  { %525 = vmatmul.f32.vlgmr.msrb.gmra.mxu0 %v985_v58  ;;  %545 = vmatmul.f32.vlgmr.msrb.gmra.mxu1 %v990_v59 }
  0xbf   :  { %v346_v7 = vpop.f32.mrf.mxu3 }
  0xc0   :  { %v326_v6 = vpop.f32.mrf.mxu2 }
  0xc1   :  { %v286_v8 = vpop.f32.mrf.mxu0  ;;  %v347_v10 = vadd.f32 %v346_v7, %v326_v6 }
  0xc2   :  { %v306_v9 = vpop.f32.mrf.mxu1 }
  0xc3   :  { %v307_v11 = vadd.f32 %v306_v9, %v286_v8  ;;  %590 = vst [vmem:[%s1436_s2 + $0x8] sm:$0xff] %v347_v10 }
  0xc5   :  { %589 = vst [vmem:[%s1436_s2] sm:$0xff] %v307_v11 }
  0xe3   :  { %v426_v13 = vpop.f32.mrf.mxu3 }
  0xe4   :  { %v406_v12 = vpop.f32.mrf.mxu2 }
  0xe5   :  { %v366_v14 = vpop.f32.mrf.mxu0  ;;  %v386_v58 = vpop.f32.mrf.mxu1  ;;  %v427_v15 = vadd.f32 %v426_v13, %v406_v12 }
  0xe6   :  { %v387_v59 = vadd.f32 %v386_v58, %v366_v14 }
  0xe7   :  { %592 = vst [vmem:[%s1436_s2 + $0x18] sm:$0xff] %v427_v15 }
  0xe8   :  { %591 = vst [vmem:[%s1436_s2 + $0x10] sm:$0xff] %v387_v59 }
  0xfe   :  { %v486_v16 = vpop.f32.mrf.mxu2  ;;  %v506_v17 = vpop.f32.mrf.mxu3 }
  0xff   :  { %v446_v18 = vpop.f32.mrf.mxu0  ;;  %v466_v19 = vpop.f32.mrf.mxu1  ;;  %v507_v20 = vadd.f32 %v506_v17, %v486_v16 }
 0x100   :  { %v467_v21 = vadd.f32 %v466_v19, %v446_v18 }
 0x101   :  { %594 = vst [vmem:[%s1436_s2 + $0x28] sm:$0xff] %v507_v20 }
 0x102   :  { %593 = vst [vmem:[%s1436_s2 + $0x20] sm:$0xff] %v467_v21 }
 0x108   :  { %v526_v22 = vpop.f32.mrf.mxu0  ;;  %v546_v23 = vpop.f32.mrf.mxu1 }
 0x109   :  { %v547_v24 = vadd.f32 %v546_v23, %v526_v22  ;;  %v566_v25 = vpop.f32.mrf.mxu2  ;;  %v586_v26 = vpop.f32.mrf.mxu3 }
 0x10a   :  { %v587_v27 = vadd.f32 %v586_v26, %v566_v25 }
 0x10b   :  { %595 = vst [vmem:[%s1436_s2 + $0x30] sm:$0xff] %v547_v24 }
 0x10c   :  { %596 = vst [vmem:[%s1436_s2 + $0x38] sm:$0xff] %v587_v27 }

</bundles_post_ra>
